<compile_context>
chip_gen: v7x
topology: tpu7x:2x2x1
jax: 0.10.0
libtpu: 0.0.40
codegen_flags: <defaults>
</compile_context>

<pallas_src>
import functools

import jax
import jax.numpy as jnp
from jax.experimental import pallas as pl
from jax.experimental.pallas import tpu as pltpu

HID = 128           # width of s1/a1/s2/a2 layers
HID2 = 2 * HID      # width of l1/l3 layers (256)
HID4 = 4 * HID      # fused first-layer width covering both heads (512)
TB_MAX = 512        # batch rows per grid step (keeps tiles a few MB, fits v7x VMEM)


def critic_kernel(
    x_ref,                      # [TB, state_dim+action_dim]  bf16 (cat(state, action))
    w1_ref, b1_ref,             # [in, 512] bf16, [1, 512] f32  (fused s1|a1|s2|a2)
    l1_w_ref, l1_b_ref,         # [256, 256] bf16, [1, 256] f32
    l3_w_ref, l3_b_ref,         # [256, 256] bf16, [1, 256] f32
    l2_w_ref, l2_b_ref,         # [1, 256] f32, [1, 1] f32      (row vector form)
    l4_w_ref, l4_b_ref,         # [1, 256] f32, [1, 1] f32
    out_ref,                    # [TB, 2] f32  (col 0 = q1, col 1 = q2)
):
    f32 = jnp.float32
    x = x_ref[...]

    # Fused first layer for both heads: h = cat(q1_s, q1_a, q2_s, q2_a).
    h = jnp.maximum(
        jnp.dot(x, w1_ref[...], preferred_element_type=f32) + b1_ref[...], 0.0)
    h_bf = h.astype(jnp.bfloat16)

    # ---- Q1 head ----  (value slice is 128-lane aligned -> free vreg select)
    q1_h = jnp.maximum(
        jnp.dot(h_bf[:, 0:HID2], l1_w_ref[...], preferred_element_type=f32)
        + l1_b_ref[...], 0.0)
    # N=1 output layer on VPU + XLU lane-reduce (avoid a 255/256-padded MXU pass).
    q1 = jnp.sum(q1_h * l2_w_ref[...], axis=-1, keepdims=True) + l2_b_ref[...]

    # ---- Q2 head ----
    q2_h = jnp.maximum(
        jnp.dot(h_bf[:, HID2:HID4], l3_w_ref[...], preferred_element_type=f32)
        + l3_b_ref[...], 0.0)
    q2 = jnp.sum(q2_h * l4_w_ref[...], axis=-1, keepdims=True) + l4_b_ref[...]

    out_ref[:, 0:1] = q1.astype(out_ref.dtype)
    out_ref[:, 1:2] = q2.astype(out_ref.dtype)


# ----------------------------------------------------------------------------
# Parameter construction (torch-equivalent layout: W as [in, out], b as [1, out])
# ----------------------------------------------------------------------------
def init_linear(key, in_features, out_features):
    """PyTorch nn.Linear default init: U(-1/sqrt(in), 1/sqrt(in))."""
    kw, kb = jax.random.split(key)
    bound = 1.0 / jnp.sqrt(jnp.float32(in_features))
    w = jax.random.uniform(kw, (in_features, out_features),
                           jnp.float32, -bound, bound)
    b = jax.random.uniform(kb, (1, out_features), jnp.float32, -bound, bound)
    return w, b


def make_params(state_dim, action_dim, seed=42):
    keys = jax.random.split(jax.random.PRNGKey(seed), 8)
    s1_w, s1_b = init_linear(keys[0], state_dim, HID)
    a1_w, a1_b = init_linear(keys[1], action_dim, HID)
    s2_w, s2_b = init_linear(keys[2], state_dim, HID)
    a2_w, a2_b = init_linear(keys[3], action_dim, HID)
    l1_w, l1_b = init_linear(keys[4], HID2, HID2)
    l2_w, l2_b = init_linear(keys[5], HID2, 1)
    l3_w, l3_b = init_linear(keys[6], HID2, HID2)
    l4_w, l4_b = init_linear(keys[7], HID2, 1)
    return (s1_w, s1_b, a1_w, a1_b,
            s2_w, s2_b, a2_w, a2_b,
            l1_w, l1_b, l2_w, l2_b,
            l3_w, l3_b, l4_w, l4_b)


def fuse_params(params, state_dim, action_dim):
    """Build the kernel-side parameter layout (block-diag first layer, bf16)."""
    (s1_w, s1_b, a1_w, a1_b,
     s2_w, s2_b, a2_w, a2_b,
     l1_w, l1_b, l2_w, l2_b,
     l3_w, l3_b, l4_w, l4_b) = params
    in_dim = state_dim + action_dim
    bf16 = jnp.bfloat16

    w1 = jnp.zeros((in_dim, HID4), jnp.float32)
    w1 = w1.at[:state_dim, 0:HID].set(s1_w)            # s1
    w1 = w1.at[state_dim:, HID:HID2].set(a1_w)         # a1
    w1 = w1.at[:state_dim, HID2:HID2 + HID].set(s2_w)  # s2
    w1 = w1.at[state_dim:, HID2 + HID:HID4].set(a2_w)  # a2
    b1 = jnp.concatenate([s1_b, a1_b, s2_b, a2_b], axis=1)

    return (w1.astype(bf16), b1,
            l1_w.astype(bf16), l1_b,
            l3_w.astype(bf16), l3_b,
            l2_w.T, l2_b,          # [1, 256] row vectors for the VPU epilogue
            l4_w.T, l4_b)


# ----------------------------------------------------------------------------
# pallas_call wrapper
# ----------------------------------------------------------------------------
def _resident_spec(shape):
    """Full-array block, same block at every grid step -> stays VMEM-resident."""
    nd = len(shape)
    return pl.BlockSpec(shape, lambda i, _nd=nd: (0,) * _nd)


@jax.jit
def critic_forward(state, action, fused_params):
    B = state.shape[0]
    in_dim = state.shape[1] + action.shape[1]
    x = jnp.concatenate([state, action], axis=1).astype(jnp.bfloat16)

    if B <= TB_MAX:
        tb, bp = B, B
    else:
        tb = TB_MAX
        bp = pl.cdiv(B, tb) * tb
        x = jnp.pad(x, ((0, bp - B), (0, 0)))

    out = pl.pallas_call(
        critic_kernel,
        out_shape=jax.ShapeDtypeStruct((bp, 2), jnp.float32),
        grid=(bp // tb,),
        in_specs=[pl.BlockSpec((tb, in_dim), lambda i: (i, 0))]
                 + [_resident_spec(p.shape) for p in fused_params],
        out_specs=pl.BlockSpec((tb, 2), lambda i: (i, 0)),
        compiler_params=pltpu.CompilerParams(
            dimension_semantics=("parallel",)),
    )(x, *fused_params)

    q = out[:B]
    return q[:, 0:1], q[:, 1:2]


# ----------------------------------------------------------------------------
# Pure-JAX f32 reference (torch semantics)
# ----------------------------------------------------------------------------
def critic_forward_ref(state, action, params):
    (s1_w, s1_b, a1_w, a1_b,
     s2_w, s2_b, a2_w, a2_b,
     l1_w, l1_b, l2_w, l2_b,
     l3_w, l3_b, l4_w, l4_b) = params
    relu = lambda v: jnp.maximum(v, 0.0)
    q1_s = relu(state @ s1_w + s1_b)
    q1_a = relu(action @ a1_w + a1_b)
    q1 = relu(jnp.concatenate([q1_s, q1_a], axis=1) @ l1_w + l1_b) @ l2_w + l2_b
    q2_s = relu(state @ s2_w + s2_b)
    q2_a = relu(action @ a2_w + a2_b)
    q2 = relu(jnp.concatenate([q2_s, q2_a], axis=1) @ l3_w + l3_b) @ l4_w + l4_b
    return q1, q2


if __name__ == "__main__":
    B, STATE_DIM, ACTION_DIM = 8, 16, 8

    key = jax.random.PRNGKey(0)
    k_s, k_a = jax.random.split(key)
    state = jax.random.normal(k_s, (B, STATE_DIM), jnp.float32)
    action = jax.random.uniform(k_a, (B, ACTION_DIM), jnp.float32, -1.0, 1.0)

    params = make_params(STATE_DIM, ACTION_DIM)
    fused = fuse_params(params, STATE_DIM, ACTION_DIM)

    q1, q2 = critic_forward(state, action, fused)
    jax.block_until_ready((q1, q2))

    q1_ref, q2_ref = critic_forward_ref(state, action, params)
    assert q1.shape == (B, 1) and q2.shape == (B, 1)
    # bf16 MXU inputs with f32 accumulation -> relaxed tolerance vs f32 ref.
    assert jnp.allclose(q1, q1_ref, atol=2e-2, rtol=2e-2), (
        float(jnp.max(jnp.abs(q1 - q1_ref))))
    assert jnp.allclose(q2, q2_ref, atol=2e-2, rtol=2e-2), (
        float(jnp.max(jnp.abs(q2 - q2_ref))))

    print("KERNEL_OK")
</pallas_src>

<mosaic_0001>
module attributes {stable_mosaic.version = 11 : i64} {
  func.func @critic_kernel(%arg0: i32, %arg1: memref<8x24xbf16, #tpu.memory_space<vmem>>, %arg2: memref<24x512xbf16, #tpu.memory_space<vmem>>, %arg3: memref<1x512xf32, #tpu.memory_space<vmem>>, %arg4: memref<256x256xbf16, #tpu.memory_space<vmem>>, %arg5: memref<1x256xf32, #tpu.memory_space<vmem>>, %arg6: memref<256x256xbf16, #tpu.memory_space<vmem>>, %arg7: memref<1x256xf32, #tpu.memory_space<vmem>>, %arg8: memref<1x256xf32, #tpu.memory_space<vmem>>, %arg9: memref<1x1xf32, #tpu.memory_space<vmem>>, %arg10: memref<1x256xf32, #tpu.memory_space<vmem>>, %arg11: memref<1x1xf32, #tpu.memory_space<vmem>>, %arg12: memref<8x2xf32, #tpu.memory_space<vmem>>) attributes {dimension_semantics = [#tpu.dimension_semantics<parallel>], iteration_bounds = array<i64: 1>, scalar_prefetch = 0 : i64, scratch_operands = 0 : i64, tpu.core_type = #tpu.core_type<tc>, window_params = [{transform_indices = @transform_0, window_bounds = array<i64: 8, 24>}, {pipeline_mode = #tpu.pipeline_mode<synchronous>, transform_indices = @transform_1, window_bounds = array<i64: 24, 512>}, {pipeline_mode = #tpu.pipeline_mode<synchronous>, transform_indices = @transform_2, window_bounds = array<i64: 1, 512>}, {pipeline_mode = #tpu.pipeline_mode<synchronous>, transform_indices = @transform_3, window_bounds = array<i64: 256, 256>}, {pipeline_mode = #tpu.pipeline_mode<synchronous>, transform_indices = @transform_4, window_bounds = array<i64: 1, 256>}, {pipeline_mode = #tpu.pipeline_mode<synchronous>, transform_indices = @transform_5, window_bounds = array<i64: 256, 256>}, {pipeline_mode = #tpu.pipeline_mode<synchronous>, transform_indices = @transform_6, window_bounds = array<i64: 1, 256>}, {pipeline_mode = #tpu.pipeline_mode<synchronous>, transform_indices = @transform_7, window_bounds = array<i64: 1, 256>}, {pipeline_mode = #tpu.pipeline_mode<synchronous>, transform_indices = @transform_8, window_bounds = array<i64: 1, 1>}, {pipeline_mode = #tpu.pipeline_mode<synchronous>, transform_indices = @transform_9, window_bounds = array<i64: 1, 256>}, {pipeline_mode = #tpu.pipeline_mode<synchronous>, transform_indices = @transform_10, window_bounds = array<i64: 1, 1>}, {transform_indices = @transform_11, window_bounds = array<i64: 8, 2>}]} {
    %c0 = arith.constant 0 : index
    %c0_0 = arith.constant 0 : index
    %0 = vector.load %arg1[%c0, %c0_0] : memref<8x24xbf16, #tpu.memory_space<vmem>>, vector<8x24xbf16>
    %c0_1 = arith.constant 0 : index
    %c0_2 = arith.constant 0 : index
    %1 = vector.load %arg2[%c0_1, %c0_2] : memref<24x512xbf16, #tpu.memory_space<vmem>>, vector<24x512xbf16>
    %cst = arith.constant dense<0.000000e+00> : vector<8x512xf32>
    %2 = tpu.matmul %0, %1, %cst {dimension_numbers = #tpu.dot_dimension_numbers<[1], [0], [0], [1], [0, 0, 1, 1], [], []>} : vector<8x24xbf16>, vector<24x512xbf16>, vector<8x512xf32> -> vector<8x512xf32>
    %c0_3 = arith.constant 0 : index
    %c0_4 = arith.constant 0 : index
    %3 = vector.load %arg3[%c0_3, %c0_4] : memref<1x512xf32, #tpu.memory_space<vmem>>, vector<1x512xf32>
    %4 = vector.broadcast %3 : vector<1x512xf32> to vector<8x512xf32>
    %5 = arith.addf %2, %4 : vector<8x512xf32>
    %cst_5 = arith.constant 0.000000e+00 : f32
    %6 = vector.broadcast %cst_5 : f32 to vector<8x512xf32>
    %7 = arith.maximumf %5, %6 : vector<8x512xf32>
    %8 = arith.truncf %7 : vector<8x512xf32> to vector<8x512xbf16>
    %9 = vector.extract_strided_slice %8 {offsets = [0, 0], sizes = [8, 256], strides = [1, 1]} : vector<8x512xbf16> to vector<8x256xbf16>
    %c0_6 = arith.constant 0 : index
    %c0_7 = arith.constant 0 : index
    %10 = vector.load %arg4[%c0_6, %c0_7] : memref<256x256xbf16, #tpu.memory_space<vmem>>, vector<256x256xbf16>
    %cst_8 = arith.constant dense<0.000000e+00> : vector<8x256xf32>
    %11 = tpu.matmul %9, %10, %cst_8 {dimension_numbers = #tpu.dot_dimension_numbers<[1], [0], [0], [1], [0, 0, 1, 1], [], []>} : vector<8x256xbf16>, vector<256x256xbf16>, vector<8x256xf32> -> vector<8x256xf32>
    %c0_9 = arith.constant 0 : index
    %c0_10 = arith.constant 0 : index
    %12 = vector.load %arg5[%c0_9, %c0_10] : memref<1x256xf32, #tpu.memory_space<vmem>>, vector<1x256xf32>
    %13 = vector.broadcast %12 : vector<1x256xf32> to vector<8x256xf32>
    %14 = arith.addf %11, %13 : vector<8x256xf32>
    %cst_11 = arith.constant 0.000000e+00 : f32
    %15 = vector.broadcast %cst_11 : f32 to vector<8x256xf32>
    %16 = arith.maximumf %14, %15 : vector<8x256xf32>
    %c0_12 = arith.constant 0 : index
    %c0_13 = arith.constant 0 : index
    %17 = vector.load %arg8[%c0_12, %c0_13] : memref<1x256xf32, #tpu.memory_space<vmem>>, vector<1x256xf32>
    %18 = vector.broadcast %17 : vector<1x256xf32> to vector<8x256xf32>
    %19 = arith.mulf %16, %18 : vector<8x256xf32>
    %cst_14 = arith.constant dense<0.000000e+00> : vector<8xf32>
    %20 = vector.multi_reduction <add>, %19, %cst_14 [1] : vector<8x256xf32> to vector<8xf32>
    %21 = vector.shape_cast %20 : vector<8xf32> to vector<8x1xf32>
    %c0_15 = arith.constant 0 : index
    %c0_16 = arith.constant 0 : index
    %22 = vector.load %arg9[%c0_15, %c0_16] : memref<1x1xf32, #tpu.memory_space<vmem>>, vector<1x1xf32>
    %23 = vector.broadcast %22 : vector<1x1xf32> to vector<8x1xf32>
    %24 = arith.addf %21, %23 : vector<8x1xf32>
    %25 = vector.extract_strided_slice %8 {offsets = [0, 256], sizes = [8, 256], strides = [1, 1]} : vector<8x512xbf16> to vector<8x256xbf16>
    %c0_17 = arith.constant 0 : index
    %c0_18 = arith.constant 0 : index
    %26 = vector.load %arg6[%c0_17, %c0_18] : memref<256x256xbf16, #tpu.memory_space<vmem>>, vector<256x256xbf16>
    %cst_19 = arith.constant dense<0.000000e+00> : vector<8x256xf32>
    %27 = tpu.matmul %25, %26, %cst_19 {dimension_numbers = #tpu.dot_dimension_numbers<[1], [0], [0], [1], [0, 0, 1, 1], [], []>} : vector<8x256xbf16>, vector<256x256xbf16>, vector<8x256xf32> -> vector<8x256xf32>
    %c0_20 = arith.constant 0 : index
    %c0_21 = arith.constant 0 : index
    %28 = vector.load %arg7[%c0_20, %c0_21] : memref<1x256xf32, #tpu.memory_space<vmem>>, vector<1x256xf32>
    %29 = vector.broadcast %28 : vector<1x256xf32> to vector<8x256xf32>
    %30 = arith.addf %27, %29 : vector<8x256xf32>
    %cst_22 = arith.constant 0.000000e+00 : f32
    %31 = vector.broadcast %cst_22 : f32 to vector<8x256xf32>
    %32 = arith.maximumf %30, %31 : vector<8x256xf32>
    %c0_23 = arith.constant 0 : index
    %c0_24 = arith.constant 0 : index
    %33 = vector.load %arg10[%c0_23, %c0_24] : memref<1x256xf32, #tpu.memory_space<vmem>>, vector<1x256xf32>
    %34 = vector.broadcast %33 : vector<1x256xf32> to vector<8x256xf32>
    %35 = arith.mulf %32, %34 : vector<8x256xf32>
    %cst_25 = arith.constant dense<0.000000e+00> : vector<8xf32>
    %36 = vector.multi_reduction <add>, %35, %cst_25 [1] : vector<8x256xf32> to vector<8xf32>
    %37 = vector.shape_cast %36 : vector<8xf32> to vector<8x1xf32>
    %c0_26 = arith.constant 0 : index
    %c0_27 = arith.constant 0 : index
    %38 = vector.load %arg11[%c0_26, %c0_27] : memref<1x1xf32, #tpu.memory_space<vmem>>, vector<1x1xf32>
    %39 = vector.broadcast %38 : vector<1x1xf32> to vector<8x1xf32>
    %40 = arith.addf %37, %39 : vector<8x1xf32>
    %c0_28 = arith.constant 0 : index
    %c0_29 = arith.constant 0 : index
    %41 = vector.load %arg12[%c0_28, %c0_29] : memref<8x2xf32, #tpu.memory_space<vmem>>, vector<8x1xf32>
    tpu.vector_store %arg12[%c0_28, %c0_29], %24 {strides = array<i32>} : memref<8x2xf32, #tpu.memory_space<vmem>>, vector<8x1xf32>,
    %c0_30 = arith.constant 0 : index
    %c1 = arith.constant 1 : index
    %42 = vector.load %arg12[%c0_30, %c1] : memref<8x2xf32, #tpu.memory_space<vmem>>, vector<8x1xf32>
    tpu.vector_store %arg12[%c0_30, %c1], %40 {strides = array<i32>} : memref<8x2xf32, #tpu.memory_space<vmem>>, vector<8x1xf32>,
    return
  }
  func.func @transform_0(%arg0: i32) -> (i32, i32) {
    %c0_i32 = arith.constant 0 : i32
    %c0_i32_0 = arith.constant 0 : i32
    return %arg0, %c0_i32 : i32, i32
  }
  func.func @transform_1(%arg0: i32) -> (i32, i32) {
    %c0_i32 = arith.constant 0 : i32
    %c0_i32_0 = arith.constant 0 : i32
    %c0_i32_1 = arith.constant 0 : i32
    return %c0_i32, %c0_i32_0 : i32, i32
  }
  func.func @transform_2(%arg0: i32) -> (i32, i32) {
    %c0_i32 = arith.constant 0 : i32
    %c0_i32_0 = arith.constant 0 : i32
    %c0_i32_1 = arith.constant 0 : i32
    return %c0_i32, %c0_i32_0 : i32, i32
  }
  func.func @transform_3(%arg0: i32) -> (i32, i32) {
    %c0_i32 = arith.constant 0 : i32
    %c0_i32_0 = arith.constant 0 : i32
    %c0_i32_1 = arith.constant 0 : i32
    return %c0_i32, %c0_i32_0 : i32, i32
  }
  func.func @transform_4(%arg0: i32) -> (i32, i32) {
    %c0_i32 = arith.constant 0 : i32
    %c0_i32_0 = arith.constant 0 : i32
    %c0_i32_1 = arith.constant 0 : i32
    return %c0_i32, %c0_i32_0 : i32, i32
  }
  func.func @transform_5(%arg0: i32) -> (i32, i32) {
    %c0_i32 = arith.constant 0 : i32
    %c0_i32_0 = arith.constant 0 : i32
    %c0_i32_1 = arith.constant 0 : i32
    return %c0_i32, %c0_i32_0 : i32, i32
  }
  func.func @transform_6(%arg0: i32) -> (i32, i32) {
    %c0_i32 = arith.constant 0 : i32
    %c0_i32_0 = arith.constant 0 : i32
    %c0_i32_1 = arith.constant 0 : i32
    return %c0_i32, %c0_i32_0 : i32, i32
  }
  func.func @transform_7(%arg0: i32) -> (i32, i32) {
    %c0_i32 = arith.constant 0 : i32
    %c0_i32_0 = arith.constant 0 : i32
    %c0_i32_1 = arith.constant 0 : i32
    return %c0_i32, %c0_i32_0 : i32, i32
  }
  func.func @transform_8(%arg0: i32) -> (i32, i32) {
    %c0_i32 = arith.constant 0 : i32
    %c0_i32_0 = arith.constant 0 : i32
    %c0_i32_1 = arith.constant 0 : i32
    return %c0_i32, %c0_i32_0 : i32, i32
  }
  func.func @transform_9(%arg0: i32) -> (i32, i32) {
    %c0_i32 = arith.constant 0 : i32
    %c0_i32_0 = arith.constant 0 : i32
    %c0_i32_1 = arith.constant 0 : i32
    return %c0_i32, %c0_i32_0 : i32, i32
  }
  func.func @transform_10(%arg0: i32) -> (i32, i32) {
    %c0_i32 = arith.constant 0 : i32
    %c0_i32_0 = arith.constant 0 : i32
    %c0_i32_1 = arith.constant 0 : i32
    return %c0_i32, %c0_i32_0 : i32, i32
  }
  func.func @transform_11(%arg0: i32) -> (i32, i32) {
    %c0_i32 = arith.constant 0 : i32
    %c0_i32_0 = arith.constant 0 : i32
    return %arg0, %c0_i32 : i32, i32
  }
}

</mosaic_0001>

<bundles_post_ra>
// kernel: critic_forward.1
= control target key start
LH: loop header
LB: loop body
LE: loop exit
PB: predicated region body
PF: predicated region fallthrough
CT: control target
= control target key end

     0   :  { %s1175_s0 = inlined_call_operand.vmem [shape: bf16[8,24], index: 0, kind: input, shape index: {}]   ;;  %s1176_s1 = inlined_call_operand.vmem [shape: bf16[24,512], index: 1, kind: input, shape index: {}]   ;;  %s1177_s2 = inlined_call_operand.vmem [shape: f32[1,512], index: 2, kind: input, shape index: {}]   ;;  %s1178_s3 = inlined_call_operand.hbm [shape: bf16[256,256], index: 3, kind: input, shape index: {}]   ;;  %s1179_s4 = inlined_call_operand.vmem [shape: f32[1,256], index: 4, kind: input, shape index: {}]   ;;  %s1180_s5 = inlined_call_operand.hbm [shape: bf16[256,256], index: 5, kind: input, shape index: {}]   ;;  %s1181_s6 = inlined_call_operand.vmem [shape: f32[1,256], index: 6, kind: input, shape index: {}]   ;;  %s1182_s7 = inlined_call_operand.vmem [shape: f32[1,256], index: 7, kind: input, shape index: {}]   ;;  %s1183_s8 = inlined_call_operand.<no memory space> [shape: f32[1,1], index: 8, kind: input, shape index: {}]   ;;  %s1184_s9 = inlined_call_operand.vmem [shape: f32[1,256], index: 9, kind: input, shape index: {}]   ;;  %s1185_s11 = inlined_call_operand.vmem [shape: f32[8,2], index: 11, kind: output, shape index: {}]   ;;  %s1186_s10 = inlined_call_operand.<no memory space> [shape: f32[1,1], index: 10, kind: input, shape index: {}]  }
   0x1   :  { %v16_v0 = vstv %s1183_s8  ;;  %v18_v1 = vstv %s1186_s10 }
   0x2   :  { %17 = vst [vmem:[#allocation2] sm:$0x1] %v16_v0  ;;  %19 = vst [vmem:[#allocation3] sm:$0x1] %v18_v1 }
   0x3   :  { %20 = vsyncpa [#allocation5], 0 }
   0x4   :  { %21 = vsyncpa [#allocation7], 0  ;;  %s1033_s21 = smov [#allocation4]   ;;  %s985_s25 = scalar_lea.hbm %s1178_s3, 4096 }
   0x5   :  { %s33_s22 = sshll.u32 %s1033_s21, 4  ;;  %p986_p0 = scmp.ne.s32.totalorder %s1178_s3, %s985_s25  ;;  %s34_s22 = int_to_ptr.vmem [resolvable:$true] %s33_s22 }
   0x6   :  { %p989_p1 = scmp.lt.u32.totalorder %s985_s25, %s1178_s3 }
   0x8   :  { %p991_p2 = pnand %p989_p1, %p986_p0 }
   0xa   :  { %994 = shalt.err (!%p991_p2)
}
   0xb   :  { %s995_s10 = scalar_lea.vmem %s34_s22, 4096  ;;  %p1000_p4 = scmp.lt.s32.totalorder %s34_s22, %s34_s22 }
   0xc   :  { %p996_p3 = scmp.ne.s32.totalorder %s34_s22, %s995_s10  ;;  %p1001_p5 = scmp.lt.s32.totalorder %s995_s10, %s995_s10 }
   0xe   :  { %p1002_p6 = por %p1001_p5, %p1000_p4 }
  0x10   :  { %p1003_p7 = pnand %p1002_p6, %p996_p3 }
  0x12   :  { %1006 = shalt.err (!%p1003_p7)
}
  0x13   :  { %s1034_s29 = smov 128   ;;  %s1035_s30 = smov 8  }
  0x14   :  { %39 = dma.hbm_to_vmem [thread:$0]  %s1178_s3, 4096, %s34_s22, [#allocation5], %s1034_s29, %s1034_s29, %s1035_s30  }
  0x15   :  { %s1036_s14 = smov [#allocation6]   ;;  %s1007_s18 = scalar_lea.hbm %s1180_s5, 4096 }
  0x16   :  { %s47_s15 = sshll.u32 %s1036_s14, 4  ;;  %p1008_p8 = scmp.ne.s32.totalorder %s1180_s5, %s1007_s18  ;;  %s48_s15 = int_to_ptr.vmem [resolvable:$true] %s47_s15 }
  0x17   :  { %p1011_p9 = scmp.lt.u32.totalorder %s1007_s18, %s1180_s5 }
  0x19   :  { %p1013_p10 = pnand %p1011_p9, %p1008_p8 }
  0x1b   :  { %1016 = shalt.err (!%p1013_p10)
}
  0x1c   :  { %s1017_s24 = scalar_lea.vmem %s48_s15, 4096  ;;  %p1022_p12 = scmp.lt.s32.totalorder %s48_s15, %s48_s15 }
  0x1d   :  { %p1018_p11 = scmp.ne.s32.totalorder %s48_s15, %s1017_s24  ;;  %p1023_p13 = scmp.lt.s32.totalorder %s1017_s24, %s1017_s24 }
  0x1f   :  { %p1024_p0 = por %p1023_p13, %p1022_p12 }
  0x21   :  { %p1025_p1 = pnand %p1024_p0, %p1018_p11 }
  0x23   :  { %1028 = shalt.err (!%p1025_p1)
}
  0x24   :  { %53 = dma.hbm_to_vmem [thread:$0]  %s1180_s5, 4096, %s48_s15, [#allocation7], %s1034_s29, %s1034_s29, %s1035_s30  }
  0x25   :  { %1029 = dma.done.wait [#allocation5], 4096  }
  0x26   :  { %1030 = vsyncadd [#allocation5], 4294963200 }
  0x27   :  { %1031 = dma.done.wait [#allocation7], 4096  }
  0x28   :  { %1032 = vsyncadd [#allocation7], 4294963200  ;;  %v1037_v2 = vmov 0   ;;  %v879_v3 = vld [vmem:[%s1176_s1 + $0xc] ss:$16 sps:$4 sm:$0xff]   ;;  %vm134_vm0 = vcmask 1043456  }
  0x29   :  { %220 = vmatprep.mubr.bf16.mxu1 %v1037_v2  ;;  %179 = vmatprep.mubr.bf16.mxu0 %v1037_v2  ;;  %v881_v4 = vld [vmem:[%s1176_s1 + $0x8] ss:$16 sps:$4 sm:$0xff]   ;;  %v884_v8 = vld [vmem:[%s1176_s1 + $0x4] ss:$16 sps:$4 sm:$0xff]   ;;  %v886_v9 = vld [vmem:[%s1176_s1] ss:$16 sps:$4 sm:$0xff]  }
  0x2a   :  { %v77_v5 = vld [vmem:[%s1176_s1 + $0x28] sm:$0xff]  ;;  %188 = vmatprep.subr.bf16.mxu1 %v879_v3  ;;  %v76_v10 = vld [vmem:[%s1176_s1 + $0x20] sm:$0xff]  ;;  %147 = vmatprep.subr.bf16.mxu0 %v884_v8  ;;  %vm130_vm1 = vcmask 195584   ;;  %v892_v19 = vld [vmem:[#allocation6 + $0x10] ss:$8 sps:$4 sm:$0xff]   ;;  %vm781_vm2 = vcmask 7168  }
  0x2b   :  { %v802_v6 = vcombine.high %v77_v5, %v77_v5  ;;  %v801_v7 = vcombine.low %v77_v5, %v77_v5  ;;  %189 = vmatpush1.bf16.msra.mxu1 %v881_v4  ;;  %v800_v12 = vcombine.high %v76_v10, %v76_v10  ;;  %v799_v13 = vcombine.low %v76_v10, %v76_v10  ;;  %v891_v14 = vld [vmem:[#allocation6 + $0x4] ss:$8 sps:$4 sm:$0xff]   ;;  %v71_v16 = vld [vmem:[%s1175_s0] sm:$0xf]  ;;  %v898_v23 = vld [vmem:[#allocation6 + $0x30] ss:$8 sps:$4 sm:$0xff]  }
  0x2c   :  { %148 = vmatpush1.bf16.msra.mxu0 %v886_v9  ;;  %v889_v17 = vld [vmem:[#allocation6] ss:$8 sps:$4 sm:$0xff]   ;;  %v894_v18 = vld [vmem:[#allocation6 + $0x14] ss:$8 sps:$4 sm:$0xff]   ;;  %v897_v20 = vld [vmem:[#allocation6 + $0x24] ss:$8 sps:$4 sm:$0xff]  }
  0x2d   :  { %805 = vmatprep.subr.msk.bf16.mxu1 %vm134_vm0, %v802_v6  ;;  %v142_v11 = vsel %vm134_vm0, %v801_v7, 0  ;;  %803 = vmatprep.subr.msk.bf16.mxu0 %vm134_vm0, %v800_v12  ;;  %v136_v15 = vsel %vm134_vm0, %v799_v13, 0  ;;  %v895_v21 = vld [vmem:[#allocation6 + $0x20] ss:$8 sps:$4 sm:$0xff]   ;;  %v900_v22 = vld [vmem:[#allocation6 + $0x34] ss:$8 sps:$4 sm:$0xff]  }
  0x2e   :  { %v903_v24 = vld [vmem:[#allocation6 + $0x44] ss:$8 sps:$4 sm:$0xff]   ;;  %v901_v25 = vld [vmem:[#allocation6 + $0x40] ss:$8 sps:$4 sm:$0xff]   ;;  %v906_v26 = vld [vmem:[#allocation6 + $0x54] ss:$8 sps:$4 sm:$0xff]  }
  0x2f   :  { %191 = vmatpush1.bf16.msra.mxu1 %v142_v11  ;;  %v904_v27 = vld [vmem:[#allocation6 + $0x50] ss:$8 sps:$4 sm:$0xff]   ;;  %v909_v28 = vld [vmem:[#allocation6 + $0x64] ss:$8 sps:$4 sm:$0xff]   ;;  %v907_v29 = vld [vmem:[#allocation6 + $0x60] ss:$8 sps:$4 sm:$0xff]  }
  0x30   :  { %713 = vmatprep.subr.bf16.mxu1 %v891_v14  ;;  %150 = vmatpush1.bf16.msra.mxu0 %v136_v15  ;;  %v912_v30 = vld [vmem:[#allocation6 + $0x74] ss:$8 sps:$4 sm:$0xff]   ;;  %v910_v31 = vld [vmem:[#allocation6 + $0x70] ss:$8 sps:$4 sm:$0xff]   ;;  %v915_v32 = vld [vmem:[#allocation6 + $0x84] ss:$8 sps:$4 sm:$0xff]  }
  0x31   :  { %v913_v33 = vld [vmem:[#allocation6 + $0x80] ss:$8 sps:$4 sm:$0xff]   ;;  %v918_v34 = vld [vmem:[#allocation6 + $0x94] ss:$8 sps:$4 sm:$0xff]   ;;  %v916_v35 = vld [vmem:[#allocation6 + $0x90] ss:$8 sps:$4 sm:$0xff]  }
  0x32   :  { %806 = vmatmul.mubr.msk.bf16.vlgmr.msra.gmra.mrb[0].mxu1 %vm130_vm1, %v71_v16  ;;  %v921_v36 = vld [vmem:[#allocation6 + $0xa4] ss:$8 sps:$4 sm:$0xff]   ;;  %v919_v37 = vld [vmem:[#allocation6 + $0xa0] ss:$8 sps:$4 sm:$0xff]   ;;  %v924_v38 = vld [vmem:[#allocation6 + $0xb4] ss:$8 sps:$4 sm:$0xff]  }
  0x33   :  { %714 = vmatpush1.bf16.msra.mxu1 %v889_v17  ;;  %804 = vmatmul.mubr.msk.bf16.vlgmr.msra.gmra.mrb[0].mxu0 %vm130_vm1, %v71_v16  ;;  %v922_v39 = vld [vmem:[#allocation6 + $0xb0] ss:$8 sps:$4 sm:$0xff]   ;;  %v927_v40 = vld [vmem:[#allocation6 + $0xc4] ss:$8 sps:$4 sm:$0xff]   ;;  %v925_v41 = vld [vmem:[#allocation6 + $0xc0] ss:$8 sps:$4 sm:$0xff]   ;;  %v80_v16 = vlaneseq }
  0x34   :  { %715 = vmatprep.subr.bf16.mxu1 %v894_v18  ;;  %v930_v42 = vld [vmem:[#allocation6 + $0xd4] ss:$8 sps:$4 sm:$0xff]   ;;  %v928_v43 = vld [vmem:[#allocation6 + $0xd0] ss:$8 sps:$4 sm:$0xff]   ;;  %v933_v44 = vld [vmem:[#allocation6 + $0xe4] ss:$8 sps:$4 sm:$0xff]  }
  0x35   :  { %v931_v45 = vld [vmem:[#allocation6 + $0xe0] ss:$8 sps:$4 sm:$0xff]   ;;  %v936_v46 = vld [vmem:[#allocation6 + $0xf4] ss:$8 sps:$4 sm:$0xff]   ;;  %v934_v47 = vld [vmem:[#allocation6 + $0xf0] ss:$8 sps:$4 sm:$0xff]  }
  0x36   :  { %v937_v48 = vld [vmem:[#allocation4] ss:$8 sps:$4 sm:$0xff]   ;;  %v939_v49 = vld [vmem:[#allocation4 + $0x4] ss:$8 sps:$4 sm:$0xff]   ;;  %v942_v50 = vld [vmem:[#allocation4 + $0x14] ss:$8 sps:$4 sm:$0xff]  }
  0x37   :  { %716 = vmatpush1.bf16.msra.mxu1 %v892_v19  ;;  %441 = vmatprep.subr.bf16.mxu0 %v939_v49  ;;  %v940_v51 = vld [vmem:[#allocation4 + $0x10] ss:$8 sps:$4 sm:$0xff]   ;;  %v945_v52 = vld [vmem:[#allocation4 + $0x24] ss:$8 sps:$4 sm:$0xff]   ;;  %v943_v53 = vld [vmem:[#allocation4 + $0x20] ss:$8 sps:$4 sm:$0xff]  }
  0x38   :  { %717 = vmatprep.subr.bf16.mxu1 %v897_v20  ;;  %442 = vmatpush1.bf16.msra.mxu0 %v937_v48  ;;  %v948_v54 = vld [vmem:[#allocation4 + $0x34] ss:$8 sps:$4 sm:$0xff]   ;;  %v946_v55 = vld [vmem:[#allocation4 + $0x30] ss:$8 sps:$4 sm:$0xff]   ;;  %v951_v56 = vld [vmem:[#allocation4 + $0x44] ss:$8 sps:$4 sm:$0xff]  }
  0x39   :  { %443 = vmatprep.subr.bf16.mxu0 %v942_v50  ;;  %v949_v57 = vld [vmem:[#allocation4 + $0x40] ss:$8 sps:$4 sm:$0xff]   ;;  %v954_v58 = vld [vmem:[#allocation4 + $0x54] ss:$8 sps:$4 sm:$0xff]   ;;  %v952_v59 = vld [vmem:[#allocation4 + $0x50] ss:$8 sps:$4 sm:$0xff]  }
  0x3a   :  { %v957_v60 = vld [vmem:[#allocation4 + $0x64] ss:$8 sps:$4 sm:$0xff]   ;;  %v955_v61 = vld [vmem:[#allocation4 + $0x60] ss:$8 sps:$4 sm:$0xff]   ;;  %v960_v62 = vld [vmem:[#allocation4 + $0x74] ss:$8 sps:$4 sm:$0xff]  }
  0x3b   :  { %718 = vmatpush1.bf16.msra.mxu1 %v895_v21  ;;  %v958_v63 = vld [vmem:[#allocation4 + $0x70] ss:$8 sps:$4 sm:$0xff]   ;;  %v963_v0 = vld [vmem:[#allocation4 + $0x84] ss:$8 sps:$4 sm:$0xff]   ;;  %v961_v1 = vld [vmem:[#allocation4 + $0x80] ss:$8 sps:$4 sm:$0xff]  }
  0x3c   :  { %719 = vmatprep.subr.bf16.mxu1 %v900_v22  ;;  %444 = vmatpush1.bf16.msra.mxu0 %v940_v51  ;;  %v966_v2 = vld [vmem:[#allocation4 + $0x94] ss:$8 sps:$4 sm:$0xff]   ;;  %v964_v3 = vld [vmem:[#allocation4 + $0x90] ss:$8 sps:$4 sm:$0xff]   ;;  %v969_v4 = vld [vmem:[#allocation4 + $0xa4] ss:$8 sps:$4 sm:$0xff]  }
  0x3d   :  { %445 = vmatprep.subr.bf16.mxu0 %v945_v52  ;;  %v967_v5 = vld [vmem:[#allocation4 + $0xa0] ss:$8 sps:$4 sm:$0xff]   ;;  %v972_v6 = vld [vmem:[#allocation4 + $0xb4] ss:$8 sps:$4 sm:$0xff]   ;;  %v970_v7 = vld [vmem:[#allocation4 + $0xb0] ss:$8 sps:$4 sm:$0xff]  }
  0x3e   :  { %v975_v8 = vld [vmem:[#allocation4 + $0xc4] ss:$8 sps:$4 sm:$0xff]   ;;  %v973_v9 = vld [vmem:[#allocation4 + $0xc0] ss:$8 sps:$4 sm:$0xff]   ;;  %v978_v10 = vld [vmem:[#allocation4 + $0xd4] ss:$8 sps:$4 sm:$0xff]  }
  0x3f   :  { %720 = vmatpush1.bf16.msra.mxu1 %v898_v23  ;;  %v976_v11 = vld [vmem:[#allocation4 + $0xd0] ss:$8 sps:$4 sm:$0xff]   ;;  %v981_v12 = vld [vmem:[#allocation4 + $0xe4] ss:$8 sps:$4 sm:$0xff]   ;;  %v979_v13 = vld [vmem:[#allocation4 + $0xe0] ss:$8 sps:$4 sm:$0xff]  }
  0x40   :  { %721 = vmatprep.subr.bf16.mxu1 %v903_v24  ;;  %446 = vmatpush1.bf16.msra.mxu0 %v943_v53  ;;  %v984_v14 = vld [vmem:[#allocation4 + $0xf4] ss:$8 sps:$4 sm:$0xff]   ;;  %v982_v15 = vld [vmem:[#allocation4 + $0xf0] ss:$8 sps:$4 sm:$0xff]   ;;  %v81_v17 = vshrl.u32 %v80_v16, 7  ;;  %vm787_vm3 = vcmask 15368  }
  0x41   :  { %447 = vmatprep.subr.bf16.mxu0 %v948_v54  ;;  %v78_v19 = vld [vmem:[%s1177_s2] sm:$0xf] }
  0x42   :  { %v90_v18 = vsub.s32 2, %v81_v17  ;;  %v94_v20 = vsub.s32 3, %v81_v17  ;;  %v82_v21 = vsub.s32 0, %v81_v17  ;;  %v86_v22 = vsub.s32 1, %v81_v17  ;;  %v269_v48 = vld [vmem:[%s1179_s4] sm:$0x3] }
  0x43   :  { %722 = vmatpush1.bf16.msra.mxu1 %v901_v25  ;;  %v756_v51 = vld [vmem:[%s1184_s9] sm:$0x3]  ;;  %s1038_s4 = smov 1  }
  0x44   :  { %723 = vmatprep.subr.bf16.mxu1 %v906_v26  ;;  %448 = vmatpush1.bf16.msra.mxu0 %v946_v55  ;;  %v91_v23 = vrot.slane %v78_v19, %v90_v18  ;;  %v95_v24 = vrot.slane %v78_v19, %v94_v20  ;;  %v83_v25 = vrot.slane %v78_v19, %v82_v21  ;;  %v484_v54 = vld [vmem:[%s1182_s7] sm:$0x3] }
  0x45   :  { %449 = vmatprep.subr.bf16.mxu0 %v951_v56  ;;  %v274_v52 = vrot.slane %v269_v48, %v82_v21  ;;  %v278_v55 = vrot.slane %v269_v48, %v86_v22  ;;  %v872_v17 = vld [vmem:[#allocation3] ss:$0 sm:$0xff]  ;;  %v839_v20 = vld [vmem:[#allocation2] ss:$0 sm:$0xff] }
  0x47   :  { %724 = vmatpush1.bf16.msra.mxu1 %v904_v27  ;;  %v87_v27 = vrot.slane %v78_v19, %v86_v22 }
  0x48   :  { %725 = vmatprep.subr.bf16.mxu1 %v909_v28  ;;  %450 = vmatpush1.bf16.msra.mxu0 %v949_v57 }
  0x49   :  { %451 = vmatprep.subr.bf16.mxu0 %v954_v58  ;;  %v761_v58 = vrot.slane %v756_v51, %v82_v21 }
  0x4b   :  { %726 = vmatpush1.bf16.msra.mxu1 %v907_v29 }
  0x4c   :  { %727 = vmatprep.subr.bf16.mxu1 %v912_v30  ;;  %452 = vmatpush1.bf16.msra.mxu0 %v952_v59 }
  0x4d   :  { %453 = vmatprep.subr.bf16.mxu0 %v957_v60 }
  0x4f   :  { %728 = vmatpush1.bf16.msra.mxu1 %v910_v31 }
  0x50   :  { %729 = vmatprep.subr.bf16.mxu1 %v915_v32  ;;  %454 = vmatpush1.bf16.msra.mxu0 %v955_v61  ;;  %v765_v61 = vrot.slane %v756_v51, %v86_v22 }
  0x51   :  { %455 = vmatprep.subr.bf16.mxu0 %v960_v62 }
  0x53   :  { %730 = vmatpush1.bf16.msra.mxu1 %v913_v33 }
  0x54   :  { %731 = vmatprep.subr.bf16.mxu1 %v918_v34  ;;  %456 = vmatpush1.bf16.msra.mxu0 %v958_v63 }
  0x55   :  { %457 = vmatprep.subr.bf16.mxu0 %v963_v0 }
  0x57   :  { %732 = vmatpush1.bf16.msra.mxu1 %v916_v35 }
  0x58   :  { %733 = vmatprep.subr.bf16.mxu1 %v921_v36  ;;  %458 = vmatpush1.bf16.msra.mxu0 %v961_v1 }
  0x59   :  { %459 = vmatprep.subr.bf16.mxu0 %v966_v2  ;;  %v489_v2 = vrot.slane %v484_v54, %v82_v21 }
  0x5b   :  { %734 = vmatpush1.bf16.msra.mxu1 %v919_v37 }
  0x5c   :  { %735 = vmatprep.subr.bf16.mxu1 %v924_v38  ;;  %460 = vmatpush1.bf16.msra.mxu0 %v964_v3 }
  0x5d   :  { %461 = vmatprep.subr.bf16.mxu0 %v969_v4 }
  0x5f   :  { %736 = vmatpush1.bf16.msra.mxu1 %v922_v39 }
  0x60   :  { %737 = vmatprep.subr.bf16.mxu1 %v927_v40  ;;  %462 = vmatpush1.bf16.msra.mxu0 %v967_v5 }
  0x61   :  { %463 = vmatprep.subr.bf16.mxu0 %v972_v6  ;;  %v493_v6 = vrot.slane %v484_v54, %v86_v22 }
  0x63   :  { %738 = vmatpush1.bf16.msra.mxu1 %v925_v41 }
  0x64   :  { %739 = vmatprep.subr.bf16.mxu1 %v930_v42  ;;  %464 = vmatpush1.bf16.msra.mxu0 %v970_v7 }
  0x65   :  { %465 = vmatprep.subr.bf16.mxu0 %v975_v8 }
  0x67   :  { %740 = vmatpush1.bf16.msra.mxu1 %v928_v43 }
  0x68   :  { %741 = vmatprep.subr.bf16.mxu1 %v933_v44  ;;  %466 = vmatpush1.bf16.msra.mxu0 %v973_v9 }
  0x69   :  { %467 = vmatprep.subr.bf16.mxu0 %v978_v10 }
  0x6b   :  { %742 = vmatpush1.bf16.msra.mxu1 %v931_v45 }
  0x6c   :  { %743 = vmatprep.subr.bf16.mxu1 %v936_v46  ;;  %468 = vmatpush1.bf16.msra.mxu0 %v976_v11 }
  0x6d   :  { %469 = vmatprep.subr.bf16.mxu0 %v981_v12 }
  0x6f   :  { %744 = vmatpush1.bf16.msra.mxu1 %v934_v47  ;;  %v541_v47 = vld [vmem:[%s1181_s6] sm:$0x3] }
  0x70   :  { %470 = vmatpush1.bf16.msra.mxu0 %v979_v13  ;;  %v546_v49 = vrot.slane %v541_v47, %v82_v21  ;;  %v550_v50 = vrot.slane %v541_v47, %v86_v22 }
  0x71   :  { %471 = vmatprep.subr.bf16.mxu0 %v984_v14 }
  0x74   :  { %472 = vmatpush1.bf16.msra.mxu0 %v982_v15 }
 0x105   :  { %v222_v26 = vpop.f32.mrb[0].mxu1 }
 0x106   :  { %v223_v28 = vadd.f32 %v222_v26, %v91_v23  ;;  %v224_v29 = vpop.f32.mrb[1].mxu1  ;;  %v181_v32 = vpop.f32.mrb[0].mxu0 }
 0x107   :  { %v225_v30 = vadd.f32 %v224_v29, %v95_v24  ;;  %v226_v31 = vpop.f32.mrb[2].mxu1  ;;  %v182_v35 = vadd.f32 %v181_v32, %v83_v25  ;;  %v183_v36 = vpop.f32.mrb[1].mxu0 }
 0x108   :  { %v231_v33 = vmax.f32 %v223_v28, 0.0  ;;  %v227_v34 = vpop.f32.mrb[3].mxu1  ;;  %v184_v38 = vadd.f32 %v183_v36, %v87_v27  ;;  %v185_v39 = vpop.f32.mrb[2].mxu0 }
 0x109   :  { %v232_v37 = vmax.f32 %v225_v30, 0.0  ;;  %v229_v40 = vmax.f32 %v182_v35, 0.0  ;;  %v186_v41 = vpop.f32.mrb[3].mxu0 }
 0x10a   :  { %v230_v43 = vmax.f32 %v184_v38, 0.0  ;;  %v235_v44 = vpack.c.bf16 %v231_v33, %v231_v33 }
 0x10b   :  { %v236_v42 = vpack.c.bf16 %v232_v37, %v232_v37  ;;  %v233_v45 = vpack.c.bf16 %v229_v40, %v229_v40 }
 0x10c   :  { %v234_v46 = vpack.c.bf16 %v230_v43, %v230_v43 }
 0x10d   :  { %745 = vmatprep.mubr.bf16.mxu1 %v236_v42 }
 0x10e   :  { %746 = vmatmul.mubr.bf16.vlgmr.msra.gmra.mrb[4].mxu1 %v235_v44  ;;  %473 = vmatprep.mubr.bf16.mxu0 %v234_v46 }
 0x10f   :  { %474 = vmatmul.mubr.bf16.vlgmr.msra.gmra.mrb[4].mxu0 %v233_v45 }
 0x1e1   :  { %v747_v53 = vpop.f32.mrb[4].mxu1 }
 0x1e2   :  { %v748_v56 = vadd.f32 %v747_v53, %v546_v49  ;;  %v749_v57 = vpop.f32.mrb[5].mxu1  ;;  %v475_v62 = vpop.f32.mrb[4].mxu0 }
 0x1e3   :  { %v750_v59 = vadd.f32 %v749_v57, %v550_v50  ;;  %v751_v60 = vpop.f32.mrb[6].mxu1  ;;  %v476_v1 = vadd.f32 %v475_v62, %v274_v52  ;;  %v477_v3 = vpop.f32.mrb[5].mxu0 }
 0x1e4   :  { %v754_v63 = vmax.f32 %v748_v56, 0.0  ;;  %v752_v0 = vpop.f32.mrb[7].mxu1  ;;  %v478_v5 = vadd.f32 %v477_v3, %v278_v55  ;;  %v479_v7 = vpop.f32.mrb[6].mxu0 }
 0x1e5   :  { %v755_v4 = vmax.f32 %v750_v59, 0.0  ;;  %v482_v9 = vmax.f32 %v476_v1, 0.0  ;;  %v480_v10 = vpop.f32.mrb[7].mxu0 }
 0x1e6   :  { %v768_v8 = vmul.f32 %v761_v58, %v754_v63  ;;  %v483_v12 = vmax.f32 %v478_v5, 0.0 }
 0x1e7   :  { %v769_v11 = vmul.f32 %v765_v61, %v755_v4  ;;  %v496_v13 = vmul.f32 %v489_v2, %v482_v9 }
 0x1e8   :  { %v497_v15 = vmul.f32 %v493_v6, %v483_v12 }
 0x1e9   :  { %v770_v14 = vadd.f32 %v769_v11, %v768_v8 }
 0x1ea   :  { %v498_v16 = vadd.f32 %v497_v15, %v496_v13 }
 0x1eb   :  { %771 = vadd.xlane.f32.xlu0 %v770_v14 }
 0x1ef   :  { %499 = vadd.xlane.f32.xlu0 %v498_v16 }
 0x278   :  { %v772_v18 = vpop.xlane.xlu0 %771 }
 0x279   :  { %v780_v19 = vadd.f32 %v872_v17, %v772_v18 }
 0x27b   :  { %784 = vrot.lane.b32.xlu1 %v780_v19, %s1038_s4 }
 0x27c   :  { %v500_v21 = vpop.xlane.xlu0 %499 }
 0x27d   :  { %v508_v22 = vadd.f32 %v839_v20, %v500_v21 }
 0x27f   :  { %782 = vst.msk [vmem:[%s1185_s11] sm:$0xff] %vm781_vm2, %v508_v22 }
 0x2ed   :  { %v785_v23 = vpop.permute.xlu1 %784 }
 0x2ee   :  { %788 = vst.msk [vmem:[%s1185_s11] sm:$0xff] %vm787_vm3, %v785_v23 }
 0x2ef   :  { %793 = vsyncpa [#allocation5], 1 }
 0x2f0   :  { %794 = vsyncpa [#allocation7], 1 }

</bundles_post_ra>
